<compile_context>
chip_gen: v5e
topology: v5e:2x2
jax: 0.10.0
libtpu: 0.0.40
codegen_flags: <defaults>
</compile_context>

<pallas_src>
import numpy as np
import jax
import jax.numpy as jnp
from jax.experimental import pallas as pl
from jax.experimental.pallas import tpu as pltpu


_VMEM_LIMIT = 48 * 1024 * 1024            # fits v7x (64 MiB/TC); v5e/v6e have 128 MiB
_X_SRC_RESIDENT_BYTES = 8 * 1024 * 1024   # keep shifted-x VMEM-resident up to this size
_X_POOL_RESIDENT_BYTES = 6 * 1024 * 1024  # per hi/lo pooled-x array


def _round_up(v, m):
    return ((v + m - 1) // m) * m


def _split_rows(n8):
    """Split a single row panel into 2 blocks (v7x megacore) when layout-legal
    for bf16 operands (second-to-last block dim must stay a multiple of 16)."""
    if n8 >= 32 and (n8 // 2) % 16 == 0:
        return n8 // 2
    return n8


def _score_tiles(n, tm_target=512, tk_target=1024):
    """Return (n_pad, tm, tk) with n_pad % tm == 0 and n_pad % tk == 0."""
    n8 = _round_up(max(n, 1), 8)
    if n8 <= tk_target:
        return n8, _split_rows(n8), n8
    n_pad = _round_up(n8, tk_target)
    return n_pad, tm_target, tk_target


def _row_tiles(k, tile=512):
    k8 = _round_up(max(k, 1), 8)
    if k8 <= tile:
        return k8, _split_rows(k8)
    return _round_up(k8, tile), tile


# --------------------------------------------------------------------------
# Pallas kernel 1: fused GraphConv(in_channels, 1) + tanh
#   grid = (N_PAD // TM, N_PAD // TK): rows parallel, contraction arbitrary.
#   The shifted-x operand is VMEM-resident (constant index_map) and sliced
#   in-kernel with pl.ds, so it is DMA'd from HBM exactly once.
# --------------------------------------------------------------------------
def _make_score_kernel(tk, x_resident):
    def kernel(x_src_ref, adj_ref, x_row_ref, w_ref, b_ref, out_ref, acc_ref):
        k = pl.program_id(1)

        @pl.when(k == 0)
        def _init():
            acc_ref[...] = jnp.zeros_like(acc_ref)

        if x_resident:
            off = pl.multiple_of(k * tk, tk)
            x_src = x_src_ref[pl.ds(off, tk), :]
        else:
            x_src = x_src_ref[...]

        # Partial neighbor aggregation; bf16 x bf16 -> f32 accumulate on MXU.
        acc_ref[...] += jnp.dot(adj_ref[...], x_src,
                                preferred_element_type=jnp.float32)

        @pl.when(k == pl.num_programs(1) - 1)
        def _finalize():
            comb = x_row_ref[...] + acc_ref[...]          # x in lanes [0:C], A@x in [C:2C]
            s = jnp.dot(comb, w_ref[...], preferred_element_type=jnp.float32)
            out_ref[...] = jnp.tanh(s + b_ref[...])
    return kernel


def graphconv_tanh_score(x_src_p, adj_p, x_row_p, w_p, b_p, *, tm, tk):
    n_pad, lanes = x_row_p.shape
    out_lanes = w_p.shape[1]
    grid = (n_pad // tm, n_pad // tk)

    x_resident = (n_pad * lanes * 2) <= _X_SRC_RESIDENT_BYTES
    if x_resident:
        x_src_spec = pl.BlockSpec((n_pad, lanes), lambda i, k: (0, 0))
        x_src_bytes = n_pad * lanes * 2
    else:
        x_src_spec = pl.BlockSpec((tk, lanes), lambda i, k: (k, 0))
        x_src_bytes = (n_pad // tm) * n_pad * lanes * 2

    cost = pl.CostEstimate(
        flops=2 * n_pad * n_pad * lanes + 2 * n_pad * lanes * out_lanes,
        transcendentals=n_pad * out_lanes,
        bytes_accessed=(n_pad * n_pad * 2            # bf16 adjacency stream
                        + x_src_bytes                # bf16 shifted x
                        + n_pad * lanes * 4          # f32 x row blocks
                        + lanes * out_lanes * 4
                        + n_pad * out_lanes * 4))
    return pl.pallas_call(
        _make_score_kernel(tk, x_resident),
        out_shape=jax.ShapeDtypeStruct((n_pad, out_lanes), jnp.float32),
        grid_spec=pltpu.PrefetchScalarGridSpec(
            num_scalar_prefetch=0,
            grid=grid,
            in_specs=[
                x_src_spec,                                             # shifted x (resident)
                pl.BlockSpec((tm, tk), lambda i, k: (i, k)),            # adjacency tile
                pl.BlockSpec((tm, lanes), lambda i, k: (i, 0)),         # x row block (f32)
                pl.BlockSpec((lanes, out_lanes), lambda i, k: (0, 0)),  # stacked [W_root; W_rel]
                pl.BlockSpec((1, out_lanes), lambda i, k: (0, 0)),      # bias
            ],
            out_specs=pl.BlockSpec((tm, out_lanes), lambda i, k: (i, 0)),
            scratch_shapes=[pltpu.VMEM((tm, lanes), jnp.float32)],
        ),
        compiler_params=pltpu.CompilerParams(
            dimension_semantics=("parallel", "arbitrary"),
            vmem_limit_bytes=_VMEM_LIMIT),
        cost_estimate=cost,
    )(x_src_p, adj_p, x_row_p, w_p, b_p)


# --------------------------------------------------------------------------
# Pallas kernel 2: pooling scatter_add as tiled one-hot matmul  new_x = S @ x
#   x is carried as bf16 hi + bf16 lo (exact reconstruction of f32) so both
#   MXU matmuls stay on the fast bf16 path; x stays VMEM-resident.
# --------------------------------------------------------------------------
def _make_pool_kernel(tk, x_resident):
    def kernel(x_hi_ref, x_lo_ref, s_ref, out_ref, acc_ref):
        k = pl.program_id(1)

        @pl.when(k == 0)
        def _init():
            acc_ref[...] = jnp.zeros_like(acc_ref)

        s_blk = s_ref[...]
        if x_resident:
            off = pl.multiple_of(k * tk, tk)
            x_hi = x_hi_ref[pl.ds(off, tk), :]
            x_lo = x_lo_ref[pl.ds(off, tk), :]
        else:
            x_hi = x_hi_ref[...]
            x_lo = x_lo_ref[...]

        # S is one-hot (exact in bf16); hi + lo reconstructs f32 x, so the two
        # bf16 matmuls into the f32 accumulator match the f32 segment sum.
        acc_ref[...] += jnp.dot(s_blk, x_hi, preferred_element_type=jnp.float32)
        acc_ref[...] += jnp.dot(s_blk, x_lo, preferred_element_type=jnp.float32)

        @pl.when(k == pl.num_programs(1) - 1)
        def _finalize():
            out_ref[...] = acc_ref[...]
    return kernel


def pool_scatter_add(x_hi_p, x_lo_p, assign_p, *, tm, tk):
    k_pad, n_pad = assign_p.shape
    c_pad = x_hi_p.shape[1]
    grid = (k_pad // tm, n_pad // tk)

    x_resident = (n_pad * c_pad * 2) <= _X_POOL_RESIDENT_BYTES
    if x_resident:
        x_spec = pl.BlockSpec((n_pad, c_pad), lambda i, k: (0, 0))
        x_bytes = n_pad * c_pad * 2
    else:
        x_spec = pl.BlockSpec((tk, c_pad), lambda i, k: (k, 0))
        x_bytes = (k_pad // tm) * n_pad * c_pad * 2

    cost = pl.CostEstimate(
        flops=4 * k_pad * n_pad * c_pad,
        transcendentals=0,
        bytes_accessed=k_pad * n_pad * 2 + 2 * x_bytes + k_pad * c_pad * 4)
    return pl.pallas_call(
        _make_pool_kernel(tk, x_resident),
        out_shape=jax.ShapeDtypeStruct((k_pad, c_pad), jnp.float32),
        grid_spec=pltpu.PrefetchScalarGridSpec(
            num_scalar_prefetch=0,
            grid=grid,
            in_specs=[
                x_spec,                                        # x hi (resident)
                x_spec,                                        # x lo (resident)
                pl.BlockSpec((tm, tk), lambda i, k: (i, k)),   # one-hot S stream
            ],
            out_specs=pl.BlockSpec((tm, c_pad), lambda i, k: (i, 0)),
            scratch_shapes=[pltpu.VMEM((tm, c_pad), jnp.float32)],
        ),
        compiler_params=pltpu.CompilerParams(
            dimension_semantics=("parallel", "arbitrary"),
            vmem_limit_bytes=_VMEM_LIMIT),
        cost_estimate=cost,
    )(x_hi_p, x_lo_p, assign_p)


# --------------------------------------------------------------------------
# Score driver: host-side packing (numpy) + kernel call + device-side slice.
# --------------------------------------------------------------------------
def compute_node_scores(x_np, edge_index_np, w_root_np, w_rel_np, bias):
    """tanh(GraphConv(x)) node scores via the fused Pallas kernel -> (N,) f32."""
    N, C = x_np.shape
    score_lanes = max(128, _round_up(2 * C, 128))
    out_lanes = 128
    n_pad, tm, tk = _score_tiles(N)

    src = edge_index_np[0].astype(np.int64)
    dst = edge_index_np[1].astype(np.int64)

    # Dense adjacency built on host; multiplicities are small ints -> exact bf16.
    adj_np = np.zeros((n_pad, n_pad), np.float32)
    np.add.at(adj_np, (dst, src), 1.0)

    x_row_np = np.zeros((n_pad, score_lanes), np.float32)
    x_row_np[:N, :C] = x_np
    x_src_np = np.zeros((n_pad, score_lanes), np.float32)
    x_src_np[:N, C:2 * C] = x_np                       # shifted copy for A @ x

    # TODO(synk): for C > 64, aggregate at round_up(C,128) lanes and do two
    # small projection matmuls at finalize instead of carrying the zero half.
    w_np = np.zeros((score_lanes, out_lanes), np.float32)
    w_np[:C, 0] = w_root_np[:, 0]
    w_np[C:2 * C, 0] = w_rel_np[:, 0]
    b_np = np.zeros((1, out_lanes), np.float32)
    b_np[0, 0] = float(bias)

    score_p = graphconv_tanh_score(
        jnp.asarray(x_src_np, dtype=jnp.bfloat16),
        jnp.asarray(adj_np, dtype=jnp.bfloat16),
        jnp.asarray(x_row_np),                         # f32 root term (cheap, more accurate)
        jnp.asarray(w_np), jnp.asarray(b_np),
        tm=tm, tk=tk)
    # Slice to the real rows / lane 0 ON DEVICE, so the D2H copy moves only
    # N floats (the greedy loop below is host resident).
    node_score = np.asarray(score_p[:N, 0])
    return node_score, n_pad


# --------------------------------------------------------------------------
# Host-side glue replicating __merge_stars_with_attr_gpu2__, coalesce,
# filter_adj (the original also runs this sequential greedy loop on CPU).
# --------------------------------------------------------------------------
def _merge_stars(edge_index_np, node_score_np, num_nodes):
    src, dst = edge_index_np[0], edge_index_np[1]
    order = np.argsort(-node_score_np, kind="stable")
    degrees = np.bincount(src, minlength=num_nodes)
    cum = np.concatenate([[0], np.cumsum(degrees)[:-1]])
    nodes_remain = np.ones(num_nodes, dtype=bool)
    cluster = np.zeros(num_nodes, dtype=np.int64)
    centers = []
    i = 0
    for node_idx in order.tolist():
        if not nodes_remain[node_idx]:
            continue
        dests = dst[cum[node_idx]: cum[node_idx] + degrees[node_idx]]
        nodes_remain[dests] = False
        nodes_remain[node_idx] = False
        centers.append(node_idx)
        cluster[node_idx] = i
        cluster[dests] = i
        i += 1
    return cluster, centers, i


def _coalesce(edge_index_np):
    pairs = np.stack([edge_index_np[0], edge_index_np[1]], axis=1)
    uniq = np.unique(pairs, axis=0)
    return uniq.T


def _filter_adj(edge_index_np, perm_np, num_nodes):
    mask = -np.ones(num_nodes, dtype=np.int64)
    mask[perm_np] = np.arange(len(perm_np))
    row, col = edge_index_np[0], edge_index_np[1]
    row, col = mask[row], mask[col]
    keep = (row >= 0) & (col >= 0)
    return np.stack([row[keep], col[keep]], axis=0)


# --------------------------------------------------------------------------
# Full forward
# --------------------------------------------------------------------------
def star_pooling_forward(x, edge_index, batch, w_root, w_rel, bias):
    """x: (N, C) f32; edge_index: (2, E) int (sorted by source); batch: (N,)."""
    x_np = np.asarray(x, dtype=np.float32)
    N, C = x_np.shape
    c_pad = _round_up(C, 128)
    ei_np = np.asarray(edge_index)
    w_root_np = np.asarray(w_root, dtype=np.float32)
    w_rel_np = np.asarray(w_rel, dtype=np.float32)

    # --- node score: tanh(GraphConv(x, edge_index))  (dropout p=0 -> identity)
    node_score, n_pad = compute_node_scores(x_np, ei_np, w_root_np, w_rel_np, bias)

    # --- greedy star contraction (sequential, data dependent -> host)
    cluster, centers, K = _merge_stars(ei_np, node_score, N)

    # --- pooled features: new_x = scatter_add(x, cluster) == S @ x (Pallas)
    k_pad, tm_pool = _row_tiles(K)
    tk_pool = min(n_pad, 1024)
    S_np = np.zeros((k_pad, n_pad), np.float32)
    S_np[cluster, np.arange(N)] = 1.0
    x_pool_np = np.zeros((n_pad, c_pad), np.float32)
    x_pool_np[:N, :C] = x_np

    x_pool = jnp.asarray(x_pool_np)                       # f32 H2D once
    x_hi = x_pool.astype(jnp.bfloat16)                    # hi/lo split (exact recombine)
    x_lo = (x_pool - x_hi.astype(jnp.float32)).astype(jnp.bfloat16)

    new_x_p = pool_scatter_add(
        x_hi, x_lo,
        jnp.asarray(S_np, dtype=jnp.bfloat16),            # one-hot: exact in bf16
        tm=tm_pool, tk=tk_pool)
    new_x = new_x_p[:K, :C]                               # device-side slice (no padded D2H)

    # --- coarse graph bookkeeping (host, as in the reference module)
    ce = np.stack([cluster[ei_np[0]], cluster[ei_np[1]]], axis=0)
    new_edge_index = _coalesce(ce)

    batch_np = np.asarray(batch)
    new_batch = np.zeros(K, dtype=batch_np.dtype)
    new_batch[cluster] = batch_np

    perm = np.array(sorted(centers), dtype=np.int64)
    filtered_edge_index = _filter_adj(new_edge_index, perm, N)

    return (new_x,
            jnp.asarray(filtered_edge_index),
            None,                                # edge_attr (None in / None out)
            jnp.asarray(new_batch),
            jnp.asarray(perm))


# --------------------------------------------------------------------------
if __name__ == "__main__":
    key = jax.random.PRNGKey(0)
    kx, kw1, kw2, kb = jax.random.split(key, 4)

    N, C = 16, 8
    x = jax.random.normal(kx, (N, C), jnp.float32)

    # edge_index sorted by source; every node has out-degree 2
    src = np.repeat(np.arange(N), 2)
    dst = np.stack([(np.arange(N) + 1) % N, (np.arange(N) + 5) % N], axis=1).reshape(-1)
    edge_index = jnp.asarray(np.stack([src, dst], axis=0).astype(np.int32))
    batch = jnp.zeros((N,), jnp.int32)

    # GraphConv(in_channels=C, out_channels=1): lin_root weight, lin_rel weight + bias
    w_root = jax.random.normal(kw1, (C, 1), jnp.float32) * 0.3
    w_rel = jax.random.normal(kw2, (C, 1), jnp.float32) * 0.3
    bias = float(jax.random.normal(kb, ()) * 0.1)

    new_x, new_ei, new_ea, new_batch, perm = star_pooling_forward(
        x, edge_index, batch, w_root, w_rel, bias)
    jax.block_until_ready(new_x)
    jax.block_until_ready(new_batch)

    # ---- lightweight correctness checks against a plain numpy reference ----
    x_np = np.asarray(x)
    ei_np = np.asarray(edge_index)
    w_root_np = np.asarray(w_root)
    w_rel_np = np.asarray(w_rel)

    adj_ref = np.zeros((N, N), np.float32)
    np.add.at(adj_ref, (ei_np[1], ei_np[0]), 1.0)
    score_ref = np.tanh(x_np @ w_root_np + (adj_ref @ x_np) @ w_rel_np + bias)[:, 0]
    score_kernel, _ = compute_node_scores(x_np, ei_np, w_root_np, w_rel_np, bias)
    # bf16 aggregation operands on the score path -> loose tolerance (ordering only)
    assert np.allclose(score_kernel, score_ref, atol=3e-2), \
        float(np.max(np.abs(score_kernel - score_ref)))

    # pooled features must match the f32 segment sum over the same clusters
    cluster, centers, K = _merge_stars(ei_np, score_kernel, N)
    new_x_ref = np.zeros((K, C), np.float32)
    np.add.at(new_x_ref, cluster, x_np)
    assert new_x.shape == (K, C)
    assert np.allclose(np.asarray(new_x), new_x_ref, atol=5e-4), \
        float(np.max(np.abs(np.asarray(new_x) - new_x_ref)))

    print("KERNEL_OK")
</pallas_src>

<mosaic_0001>
module attributes {stable_mosaic.version = 11 : i64} {
  func.func @kernel(%arg0: i32, %arg1: i32, %arg2: memref<16x128xbf16, #tpu.memory_space<vmem>>, %arg3: memref<16x16xbf16, #tpu.memory_space<vmem>>, %arg4: memref<16x128xf32, #tpu.memory_space<vmem>>, %arg5: memref<128x128xf32, #tpu.memory_space<vmem>>, %arg6: memref<1x128xf32, #tpu.memory_space<vmem>>, %arg7: memref<16x128xf32, #tpu.memory_space<vmem>>, %arg8: memref<16x128xf32, #tpu.memory_space<vmem>>) attributes {dimension_semantics = [#tpu.dimension_semantics<parallel>, #tpu.dimension_semantics<arbitrary>], iteration_bounds = array<i64: 1, 1>, scalar_prefetch = 0 : i64, scratch_operands = 1 : i64, tpu.core_type = #tpu.core_type<tc>, window_params = [{pipeline_mode = #tpu.pipeline_mode<synchronous>, transform_indices = @transform_0, window_bounds = array<i64: 16, 128>}, {transform_indices = @transform_1, window_bounds = array<i64: 16, 16>}, {transform_indices = @transform_2, window_bounds = array<i64: 16, 128>}, {pipeline_mode = #tpu.pipeline_mode<synchronous>, transform_indices = @transform_3, window_bounds = array<i64: 128, 128>}, {pipeline_mode = #tpu.pipeline_mode<synchronous>, transform_indices = @transform_4, window_bounds = array<i64: 1, 128>}, {transform_indices = @transform_5, window_bounds = array<i64: 16, 128>}]} {
    %c0_i32 = arith.constant 0 : i32
    %0 = arith.cmpi eq, %arg1, %c0_i32 : i32
    %1 = arith.extui %0 : i1 to i32
    %c0_i32_0 = arith.constant 0 : i32
    %2 = arith.cmpi ne, %1, %c0_i32_0 : i32
    scf.if %2 {
      %cst_9 = arith.constant 0.000000e+00 : f32
      %15 = vector.broadcast %cst_9 : f32 to vector<16x128xf32>
      %c0_10 = arith.constant 0 : index
      %c0_11 = arith.constant 0 : index
      %16 = vector.load %arg8[%c0_10, %c0_11] : memref<16x128xf32, #tpu.memory_space<vmem>>, vector<16x128xf32>
      tpu.vector_store %arg8[%c0_10, %c0_11], %15 {strides = array<i32>} : memref<16x128xf32, #tpu.memory_space<vmem>>, vector<16x128xf32>,
    } else {
    }
    %c16_i32 = arith.constant 16 : i32
    %3 = arith.muli %arg1, %c16_i32 : i32
    %4 = tpu.assume_multiple %3, 16 : i32
    %5 = arith.index_cast %4 : i32 to index
    %c0 = arith.constant 0 : index
    %6 = vector.load %arg2[%5, %c0] : memref<16x128xbf16, #tpu.memory_space<vmem>>, vector<16x128xbf16>
    %c0_1 = arith.constant 0 : index
    %c0_2 = arith.constant 0 : index
    %7 = vector.load %arg8[%c0_1, %c0_2] : memref<16x128xf32, #tpu.memory_space<vmem>>, vector<16x128xf32>
    %c0_3 = arith.constant 0 : index
    %c0_4 = arith.constant 0 : index
    %8 = vector.load %arg3[%c0_3, %c0_4] : memref<16x16xbf16, #tpu.memory_space<vmem>>, vector<16x16xbf16>
    %cst = arith.constant dense<0.000000e+00> : vector<16x128xf32>
    %9 = tpu.matmul %8, %6, %cst {dimension_numbers = #tpu.dot_dimension_numbers<[1], [0], [0], [1], [0, 0, 1, 1], [], []>} : vector<16x16xbf16>, vector<16x128xbf16>, vector<16x128xf32> -> vector<16x128xf32>
    %10 = arith.addf %7, %9 : vector<16x128xf32>
    %c0_5 = arith.constant 0 : index
    %c0_6 = arith.constant 0 : index
    %11 = vector.load %arg8[%c0_5, %c0_6] : memref<16x128xf32, #tpu.memory_space<vmem>>, vector<16x128xf32>
    tpu.vector_store %arg8[%c0_5, %c0_6], %10 {strides = array<i32>} : memref<16x128xf32, #tpu.memory_space<vmem>>, vector<16x128xf32>,
    %c0_i32_7 = arith.constant 0 : i32
    %12 = arith.cmpi eq, %arg1, %c0_i32_7 : i32
    %13 = arith.extui %12 : i1 to i32
    %c0_i32_8 = arith.constant 0 : i32
    %14 = arith.cmpi ne, %13, %c0_i32_8 : i32
    scf.if %14 {
      %c0_9 = arith.constant 0 : index
      %c0_10 = arith.constant 0 : index
      %15 = vector.load %arg4[%c0_9, %c0_10] : memref<16x128xf32, #tpu.memory_space<vmem>>, vector<16x128xf32>
      %c0_11 = arith.constant 0 : index
      %c0_12 = arith.constant 0 : index
      %16 = vector.load %arg8[%c0_11, %c0_12] : memref<16x128xf32, #tpu.memory_space<vmem>>, vector<16x128xf32>
      %17 = arith.addf %15, %16 : vector<16x128xf32>
      %c0_13 = arith.constant 0 : index
      %c0_14 = arith.constant 0 : index
      %18 = vector.load %arg5[%c0_13, %c0_14] : memref<128x128xf32, #tpu.memory_space<vmem>>, vector<128x128xf32>
      %cst_15 = arith.constant dense<0.000000e+00> : vector<16x128xf32>
      %19 = tpu.matmul %17, %18, %cst_15 {dimension_numbers = #tpu.dot_dimension_numbers<[1], [0], [0], [1], [0, 0, 1, 1], [], []>} : vector<16x128xf32>, vector<128x128xf32>, vector<16x128xf32> -> vector<16x128xf32>
      %c0_16 = arith.constant 0 : index
      %c0_17 = arith.constant 0 : index
      %20 = vector.load %arg6[%c0_16, %c0_17] : memref<1x128xf32, #tpu.memory_space<vmem>>, vector<1x128xf32>
      %21 = vector.broadcast %20 : vector<1x128xf32> to vector<16x128xf32>
      %22 = arith.addf %19, %21 : vector<16x128xf32>
      %23 = math.tanh %22 : vector<16x128xf32>
      %c0_18 = arith.constant 0 : index
      %c0_19 = arith.constant 0 : index
      %24 = vector.load %arg7[%c0_18, %c0_19] : memref<16x128xf32, #tpu.memory_space<vmem>>, vector<16x128xf32>
      tpu.vector_store %arg7[%c0_18, %c0_19], %23 {strides = array<i32>} : memref<16x128xf32, #tpu.memory_space<vmem>>, vector<16x128xf32>,
    } else {
    }
    return
  }
  func.func @transform_0(%arg0: i32, %arg1: i32) -> (i32, i32) {
    %c0_i32 = arith.constant 0 : i32
    %c0_i32_0 = arith.constant 0 : i32
    %c0_i32_1 = arith.constant 0 : i32
    return %c0_i32, %c0_i32_0 : i32, i32
  }
  func.func @transform_1(%arg0: i32, %arg1: i32) -> (i32, i32) {
    %c0_i32 = arith.constant 0 : i32
    return %arg0, %arg1 : i32, i32
  }
  func.func @transform_2(%arg0: i32, %arg1: i32) -> (i32, i32) {
    %c0_i32 = arith.constant 0 : i32
    %c0_i32_0 = arith.constant 0 : i32
    return %arg0, %c0_i32 : i32, i32
  }
  func.func @transform_3(%arg0: i32, %arg1: i32) -> (i32, i32) {
    %c0_i32 = arith.constant 0 : i32
    %c0_i32_0 = arith.constant 0 : i32
    %c0_i32_1 = arith.constant 0 : i32
    return %c0_i32, %c0_i32_0 : i32, i32
  }
  func.func @transform_4(%arg0: i32, %arg1: i32) -> (i32, i32) {
    %c0_i32 = arith.constant 0 : i32
    %c0_i32_0 = arith.constant 0 : i32
    %c0_i32_1 = arith.constant 0 : i32
    return %c0_i32, %c0_i32_0 : i32, i32
  }
  func.func @transform_5(%arg0: i32, %arg1: i32) -> (i32, i32) {
    %c0_i32 = arith.constant 0 : i32
    %c0_i32_0 = arith.constant 0 : i32
    return %arg0, %c0_i32 : i32, i32
  }
}

</mosaic_0001>

<bundles_post_ra>
// kernel: tpu_custom_call.1
= control target key start
LH: loop header
LB: loop body
LE: loop exit
PB: predicated region body
PF: predicated region fallthrough
CT: control target
= control target key end

     0   :  { %10 = vsyncpa [#allocation4], 0  ;;  %s449_s0 = inlined_call_operand.hbm [shape: bf16[16,128], index: 0, kind: input, shape index: {}]   ;;  %s450_s1 = inlined_call_operand.hbm [shape: bf16[16,16], index: 1, kind: input, shape index: {}]   ;;  %s451_s2 = inlined_call_operand.hbm [shape: f32[16,128], index: 2, kind: input, shape index: {}]   ;;  %s452_s3 = inlined_call_operand.hbm [shape: f32[128,128], index: 3, kind: input, shape index: {}]   ;;  %s453_s4 = inlined_call_operand.vmem [shape: f32[1,128], index: 4, kind: input, shape index: {}]   ;;  %s454_s5 = inlined_call_operand.hbm [shape: f32[16,128], index: 5, kind: output, shape index: {}]  }
   0x1   :  { %11 = vsyncpa [#allocation7], 0 }
   0x2   :  { %12 = vsyncpa [#allocation10], 0 }
   0x3   :  { %13 = vsyncpa [#allocation5], 0  ;;  %s31_s20 = sshll.u32 %s450_s1, 4  ;;  %s383_s21 = smov [#allocation6]   ;;  %s32_s20 = int_to_ptr.hbm [resolvable:$true] %s31_s20 }
   0x4   :  { %s33_s22 = sshll.u32 %s383_s21, 4  ;;  %s18_s25 = sshll.u32 %s449_s0, 4  ;;  %s34_s22 = int_to_ptr.vmem [resolvable:$true] %s33_s22  ;;  %s19_s25 = int_to_ptr.hbm [resolvable:$true] %s18_s25 }
   0x5   :  { %s384_s26 = smov 64   ;;  %s385_s27 = smov 4  }
   0x6   :  { %39 = dma.hbm_to_vmem [thread:$0]  %s32_s20, 128, %s34_s22, [#allocation7], %s384_s26, %s384_s26, %s385_s27  }
   0x7   :  { %s386_s28 = smov [#allocation3]   ;;  %s44_s7 = sshll.u32 %s451_s2, 4  ;;  %s45_s7 = int_to_ptr.hbm [resolvable:$true] %s44_s7 }
   0x8   :  { %s20_s29 = sshll.u32 %s386_s28, 4  ;;  %s387_s1 = smov [#allocation8]   ;;  %s21_s29 = int_to_ptr.vmem [resolvable:$true] %s20_s29 }
   0x9   :  { %26 = dma.hbm_to_vmem [thread:$0]  %s19_s25, 128, %s21_s29, [#allocation4], %s384_s26, %s384_s26, %s385_s27  }
   0xa   :  { %s46_s8 = sshll.u32 %s387_s1, 4  ;;  %s57_s0 = sshll.u32 %s452_s3, 4  ;;  %s47_s8 = int_to_ptr.vmem [resolvable:$true] %s46_s8  ;;  %s58_s0 = int_to_ptr.hbm [resolvable:$true] %s57_s0 }
   0xb   :  { %s388_s11 = smov 128   ;;  %s389_s12 = smov 8  }
   0xc   :  { %52 = dma.hbm_to_vmem [thread:$0]  %s45_s7, 256, %s47_s8, [#allocation7], %s388_s11, %s388_s11, %s389_s12  }
   0xd   :  { %s390_s13 = smov [#allocation9]  }
   0xe   :  { %s59_s14 = sshll.u32 %s390_s13, 4  ;;  %s60_s14 = int_to_ptr.vmem [resolvable:$true] %s59_s14 }
   0xf   :  { %65 = dma.hbm_to_vmem [thread:$0]  %s58_s0, 2048, %s60_s14, [#allocation10], %s388_s11, %s388_s11, %s389_s12  }
  0x10   :  { %375 = dma.done.wait [#allocation4], 128  }
  0x11   :  { %376 = vsyncadd [#allocation4], 4294967168 }
  0x12   :  { %377 = dma.done.wait [#allocation7], 384  }
  0x13   :  { %378 = vsyncadd [#allocation7], 4294966912 }
  0x14   :  { %379 = dma.done.wait [#allocation10], 2048  }
  0x15   :  { %380 = vsyncadd [#allocation10], 4294965248  ;;  %v223_v0 = vld [vmem:[#allocation3] sm:$0xff]  ;;  %v159_v1 = vld [vmem:[#allocation9 + $0x78] sm:$0xff]  ;;  %vm113_vm0 = vcmask 130048   ;;  %s391_s15 = smov [#allocation11]  }
  0x16   :  { %v224_v2 = vld [vmem:[#allocation6] sm:$0xff]  ;;  %164 = vmatpush.msra.mxu1 %v159_v1  ;;  %v158_v3 = vld [vmem:[#allocation9 + $0x70] sm:$0xff]  ;;  %225 = vmatpush.msra.mxu2 %v159_v1  ;;  %v156_v5 = vld [vmem:[#allocation9 + $0x60] sm:$0xff]  ;;  %s195_s16 = sshll.u32 %s391_s15, 4  ;;  %s197_s19 = sshll.u32 %s454_s5, 4  ;;  %s196_s16 = int_to_ptr.vmem [resolvable:$true] %s195_s16  ;;  %s198_s19 = int_to_ptr.hbm [resolvable:$true] %s197_s19 }
  0x17   :  { %124 = vmatpush.bf16.msra.mxu0 %v223_v0  ;;  %v157_v4 = vld [vmem:[#allocation9 + $0x68] sm:$0xff]  ;;  %v155_v6 = vld [vmem:[#allocation9 + $0x58] sm:$0xff]  ;;  %v154_v7 = vld [vmem:[#allocation9 + $0x50] sm:$0xff] }
  0x18   :  { %165 = vmatpush.msra.mxu1 %v158_v3  ;;  %226 = vmatpush.msra.mxu2 %v158_v3  ;;  %v153_v8 = vld [vmem:[#allocation9 + $0x48] sm:$0xff]  ;;  %v152_v9 = vld [vmem:[#allocation9 + $0x40] sm:$0xff]  ;;  %v151_v10 = vld [vmem:[#allocation9 + $0x38] sm:$0xff] }
  0x19   :  { %v150_v11 = vld [vmem:[#allocation9 + $0x30] sm:$0xff]  ;;  %v149_v12 = vld [vmem:[#allocation9 + $0x28] sm:$0xff]  ;;  %v148_v13 = vld [vmem:[#allocation9 + $0x20] sm:$0xff] }
  0x1a   :  { %222 = vmatmul.msk.bf16.vlgmr.msra.gmra.mxu0 %vm113_vm0, %v224_v2  ;;  %166 = vmatpush.msra.mxu1 %v157_v4  ;;  %v147_v14 = vld [vmem:[#allocation9 + $0x18] sm:$0xff]  ;;  %v146_v15 = vld [vmem:[#allocation9 + $0x10] sm:$0xff]  ;;  %v145_v16 = vld [vmem:[#allocation9 + $0x8] sm:$0xff] }
  0x1b   :  { %227 = vmatpush.msra.mxu2 %v157_v4  ;;  %v144_v17 = vld [vmem:[#allocation9] sm:$0xff]  ;;  %v138_v18 = vld [vmem:[#allocation8] sm:$0xff]  ;;  %v139_v21 = vld [vmem:[#allocation8 + $0x8] sm:$0xff] }
  0x1c   :  { %167 = vmatpush.msra.mxu1 %v156_v5  ;;  %v250_v24 = vld [vmem:[%s453_s4] ss:$0 sm:$0xff] }
  0x1d   :  { %228 = vmatpush.msra.mxu2 %v156_v5 }
  0x1e   :  { %168 = vmatpush.msra.mxu1 %v155_v6 }
  0x1f   :  { %229 = vmatpush.msra.mxu2 %v155_v6 }
  0x20   :  { %169 = vmatpush.msra.mxu1 %v154_v7 }
  0x21   :  { %230 = vmatpush.msra.mxu2 %v154_v7 }
  0x22   :  { %170 = vmatpush.msra.mxu1 %v153_v8 }
  0x23   :  { %231 = vmatpush.msra.mxu2 %v153_v8 }
  0x24   :  { %171 = vmatpush.msra.mxu1 %v152_v9 }
  0x25   :  { %232 = vmatpush.msra.mxu2 %v152_v9 }
  0x26   :  { %172 = vmatpush.msra.mxu1 %v151_v10 }
  0x27   :  { %233 = vmatpush.msra.mxu2 %v151_v10 }
  0x28   :  { %173 = vmatpush.msra.mxu1 %v150_v11 }
  0x29   :  { %234 = vmatpush.msra.mxu2 %v150_v11 }
  0x2a   :  { %174 = vmatpush.msra.mxu1 %v149_v12 }
  0x2b   :  { %235 = vmatpush.msra.mxu2 %v149_v12 }
  0x2c   :  { %175 = vmatpush.msra.mxu1 %v148_v13 }
  0x2d   :  { %236 = vmatpush.msra.mxu2 %v148_v13 }
  0x2e   :  { %176 = vmatpush.msra.mxu1 %v147_v14 }
  0x2f   :  { %237 = vmatpush.msra.mxu2 %v147_v14 }
  0x30   :  { %177 = vmatpush.msra.mxu1 %v146_v15 }
  0x31   :  { %238 = vmatpush.msra.mxu2 %v146_v15 }
  0x32   :  { %178 = vmatpush.msra.mxu1 %v145_v16 }
  0x33   :  { %239 = vmatpush.msra.mxu2 %v145_v16 }
  0x34   :  { %179 = vmatpush.msra.mxu1 %v144_v17 }
  0x35   :  { %240 = vmatpush.msra.mxu2 %v144_v17 }
  0x97   :  { %v126_v19 = vpop.f32.mrf.mxu0 }
  0x98   :  { %v142_v20 = vadd.f32 %v138_v18, %v126_v19 }
  0x9a   :  { %180 = vmatmul.f32.vlgmr.msra.gmra.mxu1 %v142_v20 }
  0x9f   :  { %v128_v22 = vpop.f32.mrf.mxu0 }
  0xa0   :  { %v143_v23 = vadd.f32 %v139_v21, %v128_v22 }
  0xa2   :  { %183 = vmatmul.f32.vlgmr.msra.gmra.mxu2 %v143_v23 }
 0x117   :  { %v181_v25 = vpop.f32.mrf.mxu1 }
 0x118   :  { %v182_v26 = vadd.f32 %v250_v24, %v181_v25 }
 0x11a   :  { %251 = vtanh.f32 %v182_v26 }
 0x120   :  { %v252_v27 = vpop.eup %251 }
 0x121   :  { %189 = vst [vmem:[#allocation11] sm:$0xff] %v252_v27 }
 0x125   :  { %v184_v28 = vpop.f32.mrf.mxu2 }
 0x126   :  { %v185_v29 = vadd.f32 %v250_v24, %v184_v28 }
 0x128   :  { %253 = vtanh.f32 %v185_v29 }
 0x12e   :  { %v254_v30 = vpop.eup %253 }
 0x12f   :  { %190 = vst [vmem:[#allocation11 + $0x8] sm:$0xff] %v254_v30 }
 0x130   :  { %203 = dma.vmem_to_hbm [thread:$0]  %s196_s16, 256, %s198_s19, [#allocation5], %s388_s11, %s388_s11, %s389_s12  }
 0x131   :  { %381 = dma.done.wait [#allocation5], 256  }
 0x132   :  { %382 = vsyncadd [#allocation5], 4294967040 }
 0x133   :  { %208 = vsyncpa [#allocation4], 1 }
 0x134   :  { %209 = vsyncpa [#allocation7], 1 }
 0x135   :  { %210 = vsyncpa [#allocation10], 1 }
 0x136   :  { %211 = vsyncpa [#allocation5], 1 }

</bundles_post_ra>
